<compile_context>
chip_gen: v6e
topology: v6e:2x2x1
jax: 0.10.0
libtpu: 0.0.40
codegen_flags: <defaults>
</compile_context>

<pallas_src>
import functools

import jax
import jax.numpy as jnp
from jax.experimental import pallas as pl
from jax.experimental.pallas import tpu as pltpu

HIDDEN = 128
OBS = 3


def _round_up(n, m):
    return ((n + m - 1) // m) * m


def _policy_kernel(x_ref, w1_ref, b1_ref, w2_ref, b2_ref, wh_ref, bh_ref, out_ref):
    """Whole forward for one batch tile.

    x_ref : (tile_b, 3)  f32       w1_ref: (3, 128)   f32 (1/255 folded in)
    w2_ref: (128, 128)   bf16      wh_ref: (128, P)   bf16 (w3 @ [wp|wv], padded)
    b*_ref: f32 biases (mask already folded into bh)  out_ref: (tile_b, P) f32
    """
    x = x_ref[...]
    w1 = w1_ref[...]
    # Layer 1 (K=3): VPU broadcast-FMAs instead of a sublane-padded MXU matmul.
    h = (x[:, 0:1] * w1[0:1, :]
         + x[:, 1:2] * w1[1:2, :]
         + x[:, 2:3] * w1[2:3, :]) + b1_ref[...]
    h = jnp.maximum(h, 0.0)
    # Layer 2: bf16 inputs, f32 accumulation; bias add + ReLU stay in f32.
    h = jnp.dot(h.astype(jnp.bfloat16), w2_ref[...],
                preferred_element_type=jnp.float32) + b2_ref[...]
    h = jnp.maximum(h, 0.0)
    # Shared layer 3 + policy head + value head (+ score mask), all folded into wh/bh.
    out_ref[...] = (
        jnp.dot(h.astype(jnp.bfloat16), wh_ref[...],
                preferred_element_type=jnp.float32) + bh_ref[...]
    )


def prepare_params(params):
    """One-time algebraic folding (call once, reuse the result every forward).

    heads(x) = (h2 @ w3 + b3) @ [wp|wv] + [bp|bv]
             =  h2 @ (w3 @ [wp|wv]) + (b3 @ [wp|wv] + [bp|bv])
    The 1/255 input scale is folded into w1.  The score<10 mask is folded into a
    second copy of the head bias (torch's `mask[:, 2:6] = 0` indexes the size-1
    axis -> empty slice, so the additive mask is a uniform -1e9 on every logit).
    """
    A = params["wp"].shape[1]
    head_pad = _round_up(A + 1, 8)           # lane-packed (logits | value) slab

    w1 = (params["w1"] * (1.0 / 255.0)).astype(jnp.float32)
    b1 = params["b1"].astype(jnp.float32)
    w2 = params["w2"].astype(jnp.bfloat16)   # bf16 weights, f32 accumulate
    b2 = params["b2"].astype(jnp.float32)

    w_head = jnp.concatenate([params["wp"], params["wv"]], axis=1)   # (128, A+1)
    b_head = jnp.concatenate([params["bp"], params["bv"]], axis=1)   # (1,   A+1)
    wh = params["w3"] @ w_head                                       # (128, A+1)
    bh = params["b3"] @ w_head + b_head                              # (1,   A+1)

    wh_p = (jnp.zeros((HIDDEN, head_pad), jnp.float32)
            .at[:, : A + 1].set(wh).astype(jnp.bfloat16))
    bh_unmasked = jnp.zeros((1, head_pad), jnp.float32).at[:, : A + 1].set(bh)
    bh_masked = bh_unmasked.at[:, :A].add(-1.0e9)   # mask lives in the f32 bias

    return dict(w1=w1, b1=b1, w2=w2, b2=b2, wh=wh_p,
                bh_unmasked=bh_unmasked, bh_masked=bh_masked)


@functools.partial(jax.jit, static_argnames=("action_space_dims", "tile_b"))
def policy_network_forward(x, folded, score, *, action_space_dims, tile_b=2048):
    """x: (B, 3) f32, score: runtime scalar. -> (logits (B,1,A), value (B,1,1))."""
    B = x.shape[0]
    A = action_space_dims
    head_pad = folded["wh"].shape[1]

    # Runtime masked/unmasked bias select -> one compiled executable for any score.
    masked = jnp.asarray(score) < 10
    bh = jnp.where(masked, folded["bh_masked"], folded["bh_unmasked"])

    # ---- batch tiling --------------------------------------------------------
    tile_b = _round_up(max(8, min(tile_b, B)), 8)          # always a multiple of 8
    # v7x has 2 TensorCores: keep >= 2 parallel grid steps when there is enough work.
    if B >= 1024 and _round_up(B, tile_b) // tile_b < 2:
        tile_b = _round_up((B + 1) // 2, 8)
    b_pad = _round_up(B, tile_b)
    if b_pad != B:
        x = jnp.pad(x, ((0, b_pad - B), (0, 0)))           # padded rows sliced off below
    grid = (b_pad // tile_b,)

    const = lambda i: (0, 0)   # weights/biases: same block every step -> VMEM-resident
    out = pl.pallas_call(
        _policy_kernel,
        out_shape=jax.ShapeDtypeStruct((b_pad, head_pad), jnp.float32),
        grid=grid,
        in_specs=[
            pl.BlockSpec((tile_b, OBS), lambda i: (i, 0)),   # x tile
            pl.BlockSpec((OBS, HIDDEN), const),              # w1 (scaled)    f32
            pl.BlockSpec((1, HIDDEN), const),                # b1             f32
            pl.BlockSpec((HIDDEN, HIDDEN), const),           # w2             bf16
            pl.BlockSpec((1, HIDDEN), const),                # b2             f32
            pl.BlockSpec((HIDDEN, head_pad), const),         # fused head W   bf16
            pl.BlockSpec((1, head_pad), const),              # fused head b   f32
        ],
        out_specs=pl.BlockSpec((tile_b, head_pad), lambda i: (i, 0)),
        compiler_params=pltpu.CompilerParams(
            dimension_semantics=("parallel",),
            vmem_limit_bytes=32 * 1024 * 1024),
    )(x, folded["w1"], folded["b1"], folded["w2"], folded["b2"], folded["wh"], bh)

    out = out[:B]
    action_logits = out[:, :A].reshape(B, 1, A)        # restore torch's unsqueeze(1)
    state_value = out[:, A:A + 1].reshape(B, 1, 1)
    return action_logits, state_value


def init_params(key, action_space_dims: int):
    """Deterministic init mirroring torch.nn.Linear default (U[-1/sqrt(fan_in), ...])."""
    def linear(key, fan_in, fan_out):
        kw, kb = jax.random.split(key)
        bound = 1.0 / jnp.sqrt(float(fan_in))
        w = jax.random.uniform(kw, (fan_in, fan_out), jnp.float32, -bound, bound)
        b = jax.random.uniform(kb, (1, fan_out), jnp.float32, -bound, bound)
        return w, b

    k1, k2, k3, kp, kv = jax.random.split(key, 5)
    w1, b1 = linear(k1, OBS, HIDDEN)
    w2, b2 = linear(k2, HIDDEN, HIDDEN)
    w3, b3 = linear(k3, HIDDEN, HIDDEN)
    wp, bp = linear(kp, HIDDEN, action_space_dims)
    wv, bv = linear(kv, HIDDEN, 1)
    return dict(w1=w1, b1=b1, w2=w2, b2=b2, w3=w3, b3=b3,
                wp=wp, bp=bp, wv=wv, bv=bv)


def _reference_forward(x, params, score: int):
    """Pure-JAX f32 reference faithful to the torch forward (unfused)."""
    xr = (x / 255.0)[:, None, :]                       # (B, 1, 3)
    h = jnp.maximum(xr @ params["w1"] + params["b1"], 0.0)
    h = jnp.maximum(h @ params["w2"] + params["b2"], 0.0)
    f = h @ params["w3"] + params["b3"]                # (B, 1, 128)
    logits = f @ params["wp"] + params["bp"]           # (B, 1, A)
    if score < 10:
        mask = jnp.full(logits.shape, -1.0e9, dtype=logits.dtype)
        mask = mask.at[:, 2:6].set(0.0)                # empty slice (size-1 axis)
        logits = logits + mask
    value = f @ params["wv"] + params["bv"]            # (B, 1, 1)
    return logits, value


if __name__ == "__main__":
    key = jax.random.PRNGKey(0)
    kx, kp = jax.random.split(key)

    B, A = 8, 6
    x = jax.random.uniform(kx, (B, OBS), jnp.float32, 0.0, 255.0)
    params = init_params(kp, A)
    folded = prepare_params(params)        # one-time folding, reused every call

    # Both masked (score<10) and unmasked branches share one compiled executable.
    # Tolerance is looser than f32 because matmuls 2/3 run bf16 with f32 accumulate.
    for score in (5, 20):
        logits, value = policy_network_forward(x, folded, score, action_space_dims=A)
        jax.block_until_ready((logits, value))
        ref_logits, ref_value = _reference_forward(x, params, score)
        assert logits.shape == (B, 1, A) and value.shape == (B, 1, 1)
        assert jnp.allclose(logits, ref_logits, atol=5e-2, rtol=5e-2)
        assert jnp.allclose(value, ref_value, atol=5e-2, rtol=5e-2)

    # Exercise the batch grid (multiple tiles + row padding: B=40, tile_b=16 -> pad 48).
    B2 = 40
    x2 = jax.random.uniform(jax.random.PRNGKey(1), (B2, OBS), jnp.float32, 0.0, 255.0)
    logits2, value2 = policy_network_forward(x2, folded, 20, action_space_dims=A,
                                             tile_b=16)
    jax.block_until_ready((logits2, value2))
    ref_l2, ref_v2 = _reference_forward(x2, params, 20)
    assert logits2.shape == (B2, 1, A) and value2.shape == (B2, 1, 1)
    assert jnp.allclose(logits2, ref_l2, atol=5e-2, rtol=5e-2)
    assert jnp.allclose(value2, ref_v2, atol=5e-2, rtol=5e-2)

    print("KERNEL_OK")
</pallas_src>

<mosaic_0001>
module attributes {stable_mosaic.version = 11 : i64} {
  func.func @_policy_kernel(%arg0: i32, %arg1: memref<8x3xf32, #tpu.memory_space<vmem>>, %arg2: memref<3x128xf32, #tpu.memory_space<vmem>>, %arg3: memref<1x128xf32, #tpu.memory_space<vmem>>, %arg4: memref<128x128xbf16, #tpu.memory_space<vmem>>, %arg5: memref<1x128xf32, #tpu.memory_space<vmem>>, %arg6: memref<128x8xbf16, #tpu.memory_space<vmem>>, %arg7: memref<1x8xf32, #tpu.memory_space<vmem>>, %arg8: memref<8x8xf32, #tpu.memory_space<vmem>>) attributes {dimension_semantics = [#tpu.dimension_semantics<parallel>], iteration_bounds = array<i64: 1>, scalar_prefetch = 0 : i64, scratch_operands = 0 : i64, tpu.core_type = #tpu.core_type<tc>, window_params = [{transform_indices = @transform_0, window_bounds = array<i64: 8, 3>}, {pipeline_mode = #tpu.pipeline_mode<synchronous>, transform_indices = @transform_1, window_bounds = array<i64: 3, 128>}, {pipeline_mode = #tpu.pipeline_mode<synchronous>, transform_indices = @transform_2, window_bounds = array<i64: 1, 128>}, {pipeline_mode = #tpu.pipeline_mode<synchronous>, transform_indices = @transform_3, window_bounds = array<i64: 128, 128>}, {pipeline_mode = #tpu.pipeline_mode<synchronous>, transform_indices = @transform_4, window_bounds = array<i64: 1, 128>}, {pipeline_mode = #tpu.pipeline_mode<synchronous>, transform_indices = @transform_5, window_bounds = array<i64: 128, 8>}, {pipeline_mode = #tpu.pipeline_mode<synchronous>, transform_indices = @transform_6, window_bounds = array<i64: 1, 8>}, {transform_indices = @transform_7, window_bounds = array<i64: 8, 8>}]} {
    %c0 = arith.constant 0 : index
    %c0_0 = arith.constant 0 : index
    %0 = vector.load %arg1[%c0, %c0_0] : memref<8x3xf32, #tpu.memory_space<vmem>>, vector<8x3xf32>
    %c0_1 = arith.constant 0 : index
    %c0_2 = arith.constant 0 : index
    %1 = vector.load %arg2[%c0_1, %c0_2] : memref<3x128xf32, #tpu.memory_space<vmem>>, vector<3x128xf32>
    %2 = vector.extract_strided_slice %0 {offsets = [0, 0], sizes = [8, 1], strides = [1, 1]} : vector<8x3xf32> to vector<8x1xf32>
    %3 = vector.extract_strided_slice %1 {offsets = [0, 0], sizes = [1, 128], strides = [1, 1]} : vector<3x128xf32> to vector<1x128xf32>
    %4 = vector.broadcast %2 : vector<8x1xf32> to vector<8x128xf32>
    %5 = vector.broadcast %3 : vector<1x128xf32> to vector<8x128xf32>
    %6 = arith.mulf %4, %5 : vector<8x128xf32>
    %7 = vector.extract_strided_slice %0 {offsets = [0, 1], sizes = [8, 1], strides = [1, 1]} : vector<8x3xf32> to vector<8x1xf32>
    %8 = vector.extract_strided_slice %1 {offsets = [1, 0], sizes = [1, 128], strides = [1, 1]} : vector<3x128xf32> to vector<1x128xf32>
    %9 = vector.broadcast %7 : vector<8x1xf32> to vector<8x128xf32>
    %10 = vector.broadcast %8 : vector<1x128xf32> to vector<8x128xf32>
    %11 = arith.mulf %9, %10 : vector<8x128xf32>
    %12 = arith.addf %6, %11 : vector<8x128xf32>
    %13 = vector.extract_strided_slice %0 {offsets = [0, 2], sizes = [8, 1], strides = [1, 1]} : vector<8x3xf32> to vector<8x1xf32>
    %14 = vector.extract_strided_slice %1 {offsets = [2, 0], sizes = [1, 128], strides = [1, 1]} : vector<3x128xf32> to vector<1x128xf32>
    %15 = vector.broadcast %13 : vector<8x1xf32> to vector<8x128xf32>
    %16 = vector.broadcast %14 : vector<1x128xf32> to vector<8x128xf32>
    %17 = arith.mulf %15, %16 : vector<8x128xf32>
    %18 = arith.addf %12, %17 : vector<8x128xf32>
    %c0_3 = arith.constant 0 : index
    %c0_4 = arith.constant 0 : index
    %19 = vector.load %arg3[%c0_3, %c0_4] : memref<1x128xf32, #tpu.memory_space<vmem>>, vector<1x128xf32>
    %20 = vector.broadcast %19 : vector<1x128xf32> to vector<8x128xf32>
    %21 = arith.addf %18, %20 : vector<8x128xf32>
    %cst = arith.constant 0.000000e+00 : f32
    %22 = vector.broadcast %cst : f32 to vector<8x128xf32>
    %23 = arith.maximumf %21, %22 : vector<8x128xf32>
    %24 = arith.truncf %23 : vector<8x128xf32> to vector<8x128xbf16>
    %c0_5 = arith.constant 0 : index
    %c0_6 = arith.constant 0 : index
    %25 = vector.load %arg4[%c0_5, %c0_6] : memref<128x128xbf16, #tpu.memory_space<vmem>>, vector<128x128xbf16>
    %cst_7 = arith.constant dense<0.000000e+00> : vector<8x128xf32>
    %26 = tpu.matmul %24, %25, %cst_7 {dimension_numbers = #tpu.dot_dimension_numbers<[1], [0], [0], [1], [0, 0, 1, 1], [], []>} : vector<8x128xbf16>, vector<128x128xbf16>, vector<8x128xf32> -> vector<8x128xf32>
    %c0_8 = arith.constant 0 : index
    %c0_9 = arith.constant 0 : index
    %27 = vector.load %arg5[%c0_8, %c0_9] : memref<1x128xf32, #tpu.memory_space<vmem>>, vector<1x128xf32>
    %28 = vector.broadcast %27 : vector<1x128xf32> to vector<8x128xf32>
    %29 = arith.addf %26, %28 : vector<8x128xf32>
    %cst_10 = arith.constant 0.000000e+00 : f32
    %30 = vector.broadcast %cst_10 : f32 to vector<8x128xf32>
    %31 = arith.maximumf %29, %30 : vector<8x128xf32>
    %32 = arith.truncf %31 : vector<8x128xf32> to vector<8x128xbf16>
    %c0_11 = arith.constant 0 : index
    %c0_12 = arith.constant 0 : index
    %33 = vector.load %arg6[%c0_11, %c0_12] : memref<128x8xbf16, #tpu.memory_space<vmem>>, vector<128x8xbf16>
    %cst_13 = arith.constant dense<0.000000e+00> : vector<8x8xf32>
    %34 = tpu.matmul %32, %33, %cst_13 {dimension_numbers = #tpu.dot_dimension_numbers<[1], [0], [0], [1], [0, 0, 1, 1], [], []>} : vector<8x128xbf16>, vector<128x8xbf16>, vector<8x8xf32> -> vector<8x8xf32>
    %c0_14 = arith.constant 0 : index
    %c0_15 = arith.constant 0 : index
    %35 = vector.load %arg7[%c0_14, %c0_15] : memref<1x8xf32, #tpu.memory_space<vmem>>, vector<1x8xf32>
    %36 = vector.broadcast %35 : vector<1x8xf32> to vector<8x8xf32>
    %37 = arith.addf %34, %36 : vector<8x8xf32>
    %c0_16 = arith.constant 0 : index
    %c0_17 = arith.constant 0 : index
    %38 = vector.load %arg8[%c0_16, %c0_17] : memref<8x8xf32, #tpu.memory_space<vmem>>, vector<8x8xf32>
    tpu.vector_store %arg8[%c0_16, %c0_17], %37 {strides = array<i32>} : memref<8x8xf32, #tpu.memory_space<vmem>>, vector<8x8xf32>,
    return
  }
  func.func @transform_0(%arg0: i32) -> (i32, i32) {
    %c0_i32 = arith.constant 0 : i32
    %c0_i32_0 = arith.constant 0 : i32
    return %arg0, %c0_i32 : i32, i32
  }
  func.func @transform_1(%arg0: i32) -> (i32, i32) {
    %c0_i32 = arith.constant 0 : i32
    %c0_i32_0 = arith.constant 0 : i32
    %c0_i32_1 = arith.constant 0 : i32
    return %c0_i32, %c0_i32_0 : i32, i32
  }
  func.func @transform_2(%arg0: i32) -> (i32, i32) {
    %c0_i32 = arith.constant 0 : i32
    %c0_i32_0 = arith.constant 0 : i32
    %c0_i32_1 = arith.constant 0 : i32
    return %c0_i32, %c0_i32_0 : i32, i32
  }
  func.func @transform_3(%arg0: i32) -> (i32, i32) {
    %c0_i32 = arith.constant 0 : i32
    %c0_i32_0 = arith.constant 0 : i32
    %c0_i32_1 = arith.constant 0 : i32
    return %c0_i32, %c0_i32_0 : i32, i32
  }
  func.func @transform_4(%arg0: i32) -> (i32, i32) {
    %c0_i32 = arith.constant 0 : i32
    %c0_i32_0 = arith.constant 0 : i32
    %c0_i32_1 = arith.constant 0 : i32
    return %c0_i32, %c0_i32_0 : i32, i32
  }
  func.func @transform_5(%arg0: i32) -> (i32, i32) {
    %c0_i32 = arith.constant 0 : i32
    %c0_i32_0 = arith.constant 0 : i32
    %c0_i32_1 = arith.constant 0 : i32
    return %c0_i32, %c0_i32_0 : i32, i32
  }
  func.func @transform_6(%arg0: i32) -> (i32, i32) {
    %c0_i32 = arith.constant 0 : i32
    %c0_i32_0 = arith.constant 0 : i32
    %c0_i32_1 = arith.constant 0 : i32
    return %c0_i32, %c0_i32_0 : i32, i32
  }
  func.func @transform_7(%arg0: i32) -> (i32, i32) {
    %c0_i32 = arith.constant 0 : i32
    %c0_i32_0 = arith.constant 0 : i32
    return %arg0, %c0_i32 : i32, i32
  }
}

</mosaic_0001>

<bundles_post_ra>
// kernel: policy_network_forward.1
= control target key start
LH: loop header
LB: loop body
LE: loop exit
PB: predicated region body
PF: predicated region fallthrough
CT: control target
= control target key end

     0   :  { %v401_v0 = vmov 0   ;;  %v402_v2 = vmov 2   ;;  %v403_v4 = vmov 0.0   ;;  %v404_v6 = vmov 1   ;;  %s530_s0 = inlined_call_operand.vmem [shape: f32[8,3], index: 0, kind: input, shape index: {}]   ;;  %s531_s3 = inlined_call_operand.vmem [shape: bf16[128,128], index: 3, kind: input, shape index: {}]   ;;  %s532_s5 = inlined_call_operand.vmem [shape: bf16[128,8], index: 5, kind: input, shape index: {}]   ;;  %s533_s1 = inlined_call_operand.vmem [shape: f32[3,128], index: 1, kind: input, shape index: {}]   ;;  %s534_s2 = inlined_call_operand.vmem [shape: f32[1,128], index: 2, kind: input, shape index: {}]   ;;  %s535_s4 = inlined_call_operand.vmem [shape: f32[1,128], index: 4, kind: input, shape index: {}]   ;;  %s536_s6 = inlined_call_operand.vmem [shape: f32[1,8], index: 6, kind: input, shape index: {}]   ;;  %s537_s7 = inlined_call_operand.vmem [shape: f32[8,8], index: 7, kind: output, shape index: {}]  }
   0x1   :  { %381 = vset.pattern.permute.xlu0 %v401_v0  ;;  %v27_v1 = vld [vmem:[%s530_s0] sm:$0xff]  ;;  %383 = vset.pattern.permute.xlu1 %v402_v2  ;;  %v385_v3 = vld [vmem:[%s531_s3 + $0x38] sm:$0xff]   ;;  %v386_v5 = vld [vmem:[%s531_s3 + $0x30] sm:$0xff]   ;;  %vm405_vm0 = vmmov 0   ;;  %v34_v19 = vlaneseq  ;;  %vm293_vm1 = vcmask 64512  }
   0x2   :  { %31 = vperm.xlu0 %381, %v27_v1   ;;  %50 = vperm.xlu1 %383, %v27_v1   ;;  %v387_v7 = vld [vmem:[%s531_s3 + $0x28] sm:$0xff]   ;;  %v388_v8 = vld [vmem:[%s531_s3 + $0x20] sm:$0xff]   ;;  %v389_v9 = vld [vmem:[%s531_s3 + $0x18] sm:$0xff]  }
   0x3   :  { %336 = vmatprep.subr.bf16.mxu0 %v403_v4  ;;  %356 = vmatprep.subr.bf16.mxu1 %v403_v4  ;;  %v393_v10 = vld [vmem:[%s532_s5 + $0x38] sm:$0xff]   ;;  %v394_v11 = vld [vmem:[%s532_s5 + $0x30] sm:$0xff]   ;;  %v395_v13 = vld [vmem:[%s532_s5 + $0x28] sm:$0xff]   ;;  %v35_v20 = vshrl.u32 %v34_v19, 7 }
   0x4   :  { %337 = vmatpush3.bf16.msra.mxu0 %v385_v3  ;;  %352 = vmatprep.mubr.msk.bf16.mxu0 %vm405_vm0, %v403_v4  ;;  %v390_v12 = vld [vmem:[%s531_s3 + $0x10] sm:$0xff]   ;;  %v391_v14 = vld [vmem:[%s531_s3 + $0x8] sm:$0xff]   ;;  %v396_v15 = vld [vmem:[%s532_s5 + $0x20] sm:$0xff]  }
   0x5   :  { %338 = vmatprep.subr.bf16.mxu0 %v403_v4  ;;  %372 = vmatprep.mubr.msk.bf16.mxu1 %vm405_vm0, %v403_v4  ;;  %v392_v16 = vld [vmem:[%s531_s3] sm:$0xff]   ;;  %v397_v17 = vld [vmem:[%s532_s5 + $0x18] sm:$0xff]   ;;  %v398_v18 = vld [vmem:[%s532_s5 + $0x10] sm:$0xff]   ;;  %v36_v21 = vsub.s32 0, %v35_v20  ;;  %v45_v22 = vsub.s32 1, %v35_v20  ;;  %v55_v23 = vsub.s32 2, %v35_v20 }
   0x6   :  { %382 = vset.pattern.permute.xlu0 %v404_v6  ;;  %357 = vmatpush3.bf16.msra.mxu1 %v393_v10  ;;  %v28_v24 = vld [vmem:[%s533_s1] sm:$0x7]  ;;  %v399_v40 = vld [vmem:[%s532_s5 + $0x8] sm:$0xff]  }
   0x7   :  { %40 = vperm.xlu0 %382, %v27_v1   ;;  %358 = vmatprep.subr.bf16.mxu1 %v403_v4  ;;  %v37_v26 = vrot.slane %v28_v24, %v36_v21  ;;  %v46_v27 = vrot.slane %v28_v24, %v45_v22  ;;  %v56_v28 = vrot.slane %v28_v24, %v55_v23  ;;  %v299_v35 = vld [vmem:[%s534_s2] ss:$0 sm:$0xff] }
   0x8   :  { %339 = vmatpush3.bf16.msra.mxu0 %v386_v5  ;;  %v400_v41 = vld [vmem:[%s532_s5] sm:$0xff]  }
   0x9   :  { %340 = vmatprep.subr.bf16.mxu0 %v403_v4  ;;  %v300_v42 = vld [vmem:[%s535_s4] ss:$0 sm:$0xff] }
   0xa   :  { %359 = vmatpush3.bf16.msra.mxu1 %v394_v11  ;;  %v309_v50 = vld [vmem:[%s536_s6] ss:$0 sm:$0xff] }
   0xb   :  { %384 = vset.pattern.permute.xlu0 %v402_v2  ;;  %360 = vmatprep.subr.bf16.mxu1 %v403_v4 }
   0xc   :  { %341 = vmatpush3.bf16.msra.mxu0 %v387_v7 }
   0xd   :  { %342 = vmatprep.subr.bf16.mxu0 %v403_v4 }
   0xe   :  { %361 = vmatpush3.bf16.msra.mxu1 %v395_v13 }
   0xf   :  { %362 = vmatprep.subr.bf16.mxu1 %v403_v4 }
  0x10   :  { %343 = vmatpush3.bf16.msra.mxu0 %v388_v8 }
  0x11   :  { %344 = vmatprep.subr.bf16.mxu0 %v403_v4 }
  0x12   :  { %363 = vmatpush3.bf16.msra.mxu1 %v396_v15 }
  0x13   :  { %364 = vmatprep.subr.bf16.mxu1 %v403_v4 }
  0x14   :  { %345 = vmatpush3.bf16.msra.mxu0 %v389_v9 }
  0x15   :  { %346 = vmatprep.subr.bf16.mxu0 %v403_v4 }
  0x16   :  { %365 = vmatpush3.bf16.msra.mxu1 %v397_v17 }
  0x17   :  { %366 = vmatprep.subr.bf16.mxu1 %v403_v4 }
  0x18   :  { %347 = vmatpush3.bf16.msra.mxu0 %v390_v12 }
  0x19   :  { %348 = vmatprep.subr.bf16.mxu0 %v403_v4 }
  0x1a   :  { %367 = vmatpush3.bf16.msra.mxu1 %v398_v18 }
  0x1b   :  { %368 = vmatprep.subr.bf16.mxu1 %v403_v4 }
  0x1c   :  { %349 = vmatpush3.bf16.msra.mxu0 %v391_v14 }
  0x1d   :  { %350 = vmatprep.subr.bf16.mxu0 %v403_v4 }
  0x1e   :  { %369 = vmatpush3.bf16.msra.mxu1 %v399_v40 }
  0x1f   :  { %370 = vmatprep.subr.bf16.mxu1 %v403_v4 }
  0x20   :  { %351 = vmatpush3.bf16.msra.mxu0 %v392_v16 }
  0x22   :  { %371 = vmatpush3.bf16.msra.mxu1 %v400_v41 }
  0x7d   :  { %v32_v25 = vpop.permute.xlu0 %31  ;;  %v51_v29 = vpop.permute.xlu1 %50 }
  0x7e   :  { %v38_v31 = vmul.f32 %v37_v26, %v32_v25  ;;  %v57_v33 = vmul.f32 %v56_v28, %v51_v29 }
  0x82   :  { %v41_v30 = vpop.permute.xlu0 %40 }
  0x83   :  { %v47_v32 = vmul.f32 %v46_v27, %v41_v30 }
  0x85   :  { %v48_v34 = vadd.f32 %v47_v32, %v38_v31 }
  0x87   :  { %v58_v36 = vadd.f32 %v57_v33, %v48_v34 }
  0x89   :  { %v66_v37 = vadd.f32 %v299_v35, %v58_v36 }
  0x8b   :  { %v67_v38 = vmax.f32 %v66_v37, 0.0 }
  0x8d   :  { %v68_v39 = vpack.c.bf16 %v67_v38, %v67_v38 }
  0x8f   :  { %353 = vmatmul.mubr.bf16.vlgmr.msra.gmra.mxu0 %v68_v39 }
 0x14f   :  { %v174_v43 = vpop.f32.mrf.mxu0 }
 0x150   :  { %v175_v44 = vadd.f32 %v300_v42, %v174_v43 }
 0x151   :  { %v354_v45 = vpop.f32.mrf.mxu0 }
 0x152   :  { %v180_v46 = vmax.f32 %v175_v44, 0.0 }
 0x153   :  { %v177_v47 = vpop.f32.mrf.mxu0 }
 0x154   :  { %v181_v48 = vpack.c.bf16 %v180_v46, %v180_v46 }
 0x155   :  { %v355_v49 = vpop.f32.mrf.mxu0 }
 0x156   :  { %373 = vmatmul.mubr.bf16.vlgmr.msra.gmra.mxu1 %v181_v48 }
 0x216   :  { %v287_v51 = vpop.f32.mrf.mxu1 }
 0x217   :  { %v288_v52 = vadd.f32 %v309_v50, %v287_v51 }
 0x218   :  { %v374_v53 = vpop.f32.mrf.mxu1 }
 0x219   :  { %294 = vst.msk [vmem:[%s537_s7] sm:$0xff] %vm293_vm1, %v288_v52 }
 0x21a   :  { %v290_v54 = vpop.f32.mrf.mxu1 }
 0x21c   :  { %v375_v55 = vpop.f32.mrf.mxu1 }

</bundles_post_ra>
